<compile_context>
chip_gen: v5e
topology: v5e:2x2
jax: 0.10.0
libtpu: 0.0.40
codegen_flags: <defaults>
</compile_context>

<pallas_src>
import jax
import jax.numpy as jnp
from jax.experimental import pallas as pl
from jax.experimental.pallas import tpu as pltpu


def _round_up(x, m):
    return ((x + m - 1) // m) * m


# ---------------------------------------------------------------------------
# Pre-pass: row-wise L2 normalization (used once for the target embeddings)
# ---------------------------------------------------------------------------
def _l2norm_kernel(x_ref, o_ref):
    x = x_ref[...].astype(jnp.float32)
    # matches torch: x / x.norm(dim=-1, keepdim=True)  (no eps clamp; zero rows -> NaN)
    inv = jax.lax.rsqrt(jnp.sum(x * x, axis=-1, keepdims=True))
    o_ref[...] = x * inv


def _l2_normalize_rows(x, *, tile):
    n, d = x.shape
    return pl.pallas_call(
        _l2norm_kernel,
        out_shape=jax.ShapeDtypeStruct((n, d), jnp.float32),
        grid_spec=pltpu.PrefetchScalarGridSpec(
            num_scalar_prefetch=0,
            grid=(n // tile,),
            in_specs=[pl.BlockSpec((tile, d), lambda i: (i, 0))],
            out_specs=pl.BlockSpec((tile, d), lambda i: (i, 0)),
        ),
        compiler_params=pltpu.CompilerParams(dimension_semantics=("parallel",)),
    )(x)


# ---------------------------------------------------------------------------
# Main kernel: normalized source tile (cached in VMEM scratch) @ normalized target tile
# ---------------------------------------------------------------------------
def _sim_kernel(s_ref, t_ref, sim_ref, s_norm_ref):
    # Normalize the (tm, D) source tile only on the first column step; reuse across j.
    @pl.when(pl.program_id(1) == 0)
    def _():
        s = s_ref[...].astype(jnp.float32)
        inv = jax.lax.rsqrt(jnp.sum(s * s, axis=-1, keepdims=True))
        s_norm_ref[...] = s * inv

    # (tm, D) x (tn, D), contracting dim 1 of both -> (tm, tn); no transpose materialized.
    sim_ref[...] = jax.lax.dot_general(
        s_norm_ref[...],
        t_ref[...],
        dimension_numbers=(((1,), (1,)), ((), ())),
        preferred_element_type=jnp.float32,
    )


def stable_gm_similarity(h_s, h_t, *, tm=512, tn=256):
    """StableGM eval-path similarity.

    h_s: [N_s, D] source node embeddings (output of f_update on graph_s)
    h_t: [N_t, D] target node embeddings (output of f_update on graph_t)
    Returns sim_mat: [1, N_s, N_t] float32.
    """
    n_s, d = h_s.shape
    n_t, d_t = h_t.shape
    assert d == d_t

    # Pick aligned tiles and pad the node axes so tiles divide evenly (lane-dense output).
    tm = min(tm, _round_up(n_s, 8))
    tn = min(tn, _round_up(n_t, 128))
    n_s_pad = _round_up(n_s, tm)
    n_t_pad = _round_up(n_t, tn)

    h_s_p = jnp.pad(h_s.astype(jnp.float32), ((0, n_s_pad - n_s), (0, 0)))
    h_t_p = jnp.pad(h_t.astype(jnp.float32), ((0, n_t_pad - n_t), (0, 0)))

    # One-shot pre-pass: normalize the target once (hoisted out of the O(N_s*N_t) loop).
    # Padded zero rows normalize to NaN but only produce columns that are sliced off below.
    t_norm = _l2_normalize_rows(h_t_p, tile=tn)

    sim = pl.pallas_call(
        _sim_kernel,
        out_shape=jax.ShapeDtypeStruct((n_s_pad, n_t_pad), jnp.float32),
        grid_spec=pltpu.PrefetchScalarGridSpec(
            num_scalar_prefetch=0,
            grid=(n_s_pad // tm, n_t_pad // tn),
            in_specs=[
                pl.BlockSpec((tm, d), lambda i, j: (i, 0)),   # source row tile (same block across j)
                pl.BlockSpec((tn, d), lambda i, j: (j, 0)),   # pre-normalized target column tile
            ],
            out_specs=pl.BlockSpec((tm, tn), lambda i, j: (i, j)),
            scratch_shapes=[pltpu.VMEM((tm, d), jnp.float32)],
        ),
        compiler_params=pltpu.CompilerParams(
            dimension_semantics=("parallel", "arbitrary"),
            vmem_limit_bytes=64 * 1024 * 1024,
        ),
    )(h_s_p, t_norm)

    return sim[:n_s, :n_t][None]  # [1, N_s, N_t]


def _reference(h_s, h_t):
    hs = h_s / jnp.linalg.norm(h_s, axis=-1, keepdims=True)
    ht = h_t / jnp.linalg.norm(h_t, axis=-1, keepdims=True)
    return (hs @ ht.T)[None]


if __name__ == "__main__":
    # Small shapes consistent with the module: node embedding dim 128 (typical GNN width),
    # source/target graphs with a few hundred nodes (exercises both grid axes + padding).
    N_S, N_T, D = 320, 384, 128

    key = jax.random.PRNGKey(0)
    ks, kt = jax.random.split(key)

    # TODO(synk): f_update is an injected GNN (message passing over edge_index/edge_attr) with no
    # fixed architecture; it runs outside this kernel. Here raw node features stand in for h_s/h_t.
    h_s = jax.random.normal(ks, (N_S, D), dtype=jnp.float32)
    h_t = jax.random.normal(kt, (N_T, D), dtype=jnp.float32)

    sim = stable_gm_similarity(h_s, h_t)
    sim = jax.block_until_ready(sim)

    ref = _reference(h_s, h_t)
    assert sim.shape == (1, N_S, N_T), sim.shape
    err = float(jnp.max(jnp.abs(sim - ref)))
    assert jnp.allclose(sim, ref, atol=1e-4, rtol=1e-4), err

    print("KERNEL_OK")
</pallas_src>

<mosaic_0001>
module attributes {stable_mosaic.version = 11 : i64} {
  func.func @_l2norm_kernel(%arg0: i32, %arg1: memref<256x128xf32, #tpu.memory_space<vmem>>, %arg2: memref<256x128xf32, #tpu.memory_space<vmem>>) attributes {dimension_semantics = [#tpu.dimension_semantics<parallel>], iteration_bounds = array<i64: 2>, scalar_prefetch = 0 : i64, scratch_operands = 0 : i64, tpu.core_type = #tpu.core_type<tc>, window_params = [{transform_indices = @transform_0, window_bounds = array<i64: 256, 128>}, {transform_indices = @transform_1, window_bounds = array<i64: 256, 128>}]} {
    %c0 = arith.constant 0 : index
    %c0_0 = arith.constant 0 : index
    %0 = vector.load %arg1[%c0, %c0_0] : memref<256x128xf32, #tpu.memory_space<vmem>>, vector<256x128xf32>
    %1 = arith.mulf %0, %0 : vector<256x128xf32>
    %cst = arith.constant dense<0.000000e+00> : vector<256xf32>
    %2 = vector.multi_reduction <add>, %1, %cst [1] : vector<256x128xf32> to vector<256xf32>
    %3 = vector.shape_cast %2 : vector<256xf32> to vector<256x1xf32>
    %4 = math.rsqrt %3 : vector<256x1xf32>
    %5 = vector.broadcast %4 : vector<256x1xf32> to vector<256x128xf32>
    %6 = arith.mulf %0, %5 : vector<256x128xf32>
    %c0_1 = arith.constant 0 : index
    %c0_2 = arith.constant 0 : index
    %7 = vector.load %arg2[%c0_1, %c0_2] : memref<256x128xf32, #tpu.memory_space<vmem>>, vector<256x128xf32>
    tpu.vector_store %arg2[%c0_1, %c0_2], %6 {strides = array<i32>} : memref<256x128xf32, #tpu.memory_space<vmem>>, vector<256x128xf32>,
    return
  }
  func.func @transform_0(%arg0: i32) -> (i32, i32) {
    %c0_i32 = arith.constant 0 : i32
    %c0_i32_0 = arith.constant 0 : i32
    return %arg0, %c0_i32 : i32, i32
  }
  func.func @transform_1(%arg0: i32) -> (i32, i32) {
    %c0_i32 = arith.constant 0 : i32
    %c0_i32_0 = arith.constant 0 : i32
    return %arg0, %c0_i32 : i32, i32
  }
}

</mosaic_0001>

<bundles_post_ra>
// kernel: tpu_custom_call.1
= control target key start
LH: loop header
LB: loop body
LE: loop exit
PB: predicated region body
PF: predicated region fallthrough
CT: control target
= control target key end

     0   :  { %6 = vsyncpa [#allocation3], 0  ;;  %s1668_s0 = inlined_call_operand.hbm [shape: f32[512,128], index: 0, kind: input, shape index: {}]   ;;  %s1669_s1 = inlined_call_operand.hbm [shape: f32[512,128], index: 1, kind: output, shape index: {}]  }
   0x1   :  { %8 = vsyncpa [#allocation3 + $0x1], 0 }
   0x2   :  { %9 = vsyncpa [#allocation4], 0 }
   0x3   :  { %11 = vsyncpa [#allocation4 + $0x1], 0  ;;  %s982_s6 = smov 0   ;;  %s984_s7 = smov 0  }
   0x4   :  { %s986_s8 = smov 0   ;;  %s988_s9 = smov 0  }
   0x5 LB: > { %s1003_s10 = sadd.s32 4294967295, %s966_s9   ;;  %s740_s11 = sadd.s32 4294967294, %s966_s9   ;;  %s966_s9 = sphi %s988_s9, %s1679_s9   ;;  %s962_s8 = sphi %s986_s8, %s1678_s8   ;;  %s958_s7 = sphi %s984_s7, %s1677_s7   ;;  %s954_s6 = sphi %s982_s6, %s1676_s6  }
   0x6   : > { %s1007_s12 = sadd.s32 1, %s966_s9   ;;  %s24_s13 = sadd.s32 1, %s962_s8 }
   0x7   : > { %s21_s14 = ssub.s32 %s966_s9, %s1007_s12  ;;  %p31_p0 = scmp.ne.s32.totalorder %s962_s8, %s958_s7 }
   0x8   : > { %p22_p1 = scmp.eq.s32.totalorder %s21_s14, 0  ;;  %p32_p2 = scmp.eq.s32.totalorder %s966_s9, 0 }
   0x9   : > { %p37_p3 = scmp.ne.s32.totalorder %s958_s7, %s954_s6  ;;  %p38_p4 = scmp.eq.s32.totalorder %s1003_s10, 0 }
   0xa   : > { %s1019_s15 = scalar_select %p22_p1, %s962_s8, %s24_s13  }
   0xb   : > { %p1021_p5 = por %p32_p2, %p31_p0  ;;  %p1025_p6 = por %p38_p4, %p37_p3 }
   0xc   : > { %p61_p7 = scmp.eq.s32.totalorder %s1003_s10, 1  ;;  %p67_p8 = scmp.eq.s32.totalorder %s740_s11, 1 }
   0xd   : > { %p768_p10 = scmp.lt.s32.totalorder %s966_s9, 2  ;;  %s87_s20 = sand.u32 1, %s962_s8  }
   0xe   : > { %p1032_p11 = por %p61_p7, %p31_p0  ;;  %p1036_p12 = por %p67_p8, %p37_p3 }
   0xf   : > { %s754_s21 = sshll.u32 %s966_s9, 8  ;;  %s743_s22 = sshll.u32 %s87_s20, 8 }
  0x10   : > { %s96_s25 = scalar_lea.hbm %s1668_s0, %s754_s21  ;;  %s91_s27 = scalar_lea.vmem [#allocation2], %s743_s22 }
  0x11   : > { %s97_s26 = sshll.u32 %s96_s25, 4  ;;  %s99_s28 = sshll.u32 %s91_s27, 4  ;;  %s98_s26 = int_to_ptr.hbm [resolvable:$true] %s97_s26  ;;  %s100_s28 = int_to_ptr.vmem [resolvable:$true] %s99_s28 }
  0x12   : > { %p1047_p13 = pnand %p768_p10, %p1021_p5  ;;  %p746_p0 = scmp.ge.s32.totalorder %s966_s9, 1 }
  0x13   : > { %p107_p1 = scmp.lt.s32.totalorder %s966_s9, 3  ;;  %s88_s30 = scalar_lea.sflag [#allocation3], %s87_s20 }
  0x14   : > { %s870_s2 = sshra.s32 %s98_s26, 4  ;;  %p874_p3 = pneg %p1047_p13  ;;  %s871_s2 = int_to_ptr.hbm [resolvable:$true] %s870_s2 }
  0x15   : > { %s872_s3 = scalar_lea.hbm %s871_s2, 256  ;;  %s877_s11 = scalar_lea.hbm %s1668_s0, 512 }
  0x16   : > { %p873_p2 = scmp.ne.s32.totalorder %s871_s2, %s872_s3  ;;  %p878_p5 = scmp.lt.s32.totalorder %s871_s2, %s1668_s0 }
  0x17   : > { %p879_p8 = scmp.lt.s32.totalorder %s877_s11, %s872_s3 }
  0x18   : > { %p875_p4 = pnand %p874_p3, %p873_p2 }
  0x19   : > { %p880_p10 = por %p879_p8, %p878_p5 }
  0x1a   : > { %p876_p7 = pneg %p875_p4 }
  0x1c   : > { %p881_p9 = pnand %p880_p10, %p876_p7 }
  0x1e   : > { %884 = shalt.err (!%p881_p9)
}
  0x1f   : > { %s968_s16 = smov 128   ;;  %s969_s20 = smov 8  }
  0x20   : > { %763 = dma.hbm_to_vmem [thread:$0]  (!%p1047_p13), %s98_s26, 4096, %s100_s28, %s88_s30, %s968_s16, %s968_s16, %s969_s20  }
  0x21   : > { %p108_p2 = pnand %p746_p0, %p107_p1 }
  0x22   : > { %s1068_s21 = sand.u32 (!%p108_p2), 1, %s958_s7  }
  0x23   : > { %111 = sbr.rel (%p108_p2) target bundleno = 267 (0x10b), region = 24  ;;  %s747_s22 = sshll.u32 (!%p108_p2), %s1068_s21, 8 }
  0x24   : > { %s114_s23 = scalar_lea.sflag (!%p108_p2), [#allocation3], %s1068_s21  ;;  %s1074_s24 = scalar_lea.vmem (!%p108_p2), [#allocation2], %s747_s22 }
  0x28   : > { %945 = dma.done.wait (%p1025_p6), %s114_s23, 4096  }
  0x29   : > { %947 = vsyncadd (%p1025_p6), %s114_s23, 4294963200  ;;  %v1081_v0 = vld [vmem:[%s1074_s24 + $0x20] sm:$0xff]  ;;  %v1084_v1 = vld [vmem:[%s1074_s24 + $0x10] sm:$0xff]  ;;  %s1279_s17 = scalar_lea.vmem [#allocation5], %s747_s22  ;;  %s755_s25 = sshll.u32 %s1003_s10, 8 }
  0x2a   : > { %v1087_v2 = vld [vmem:[%s1074_s24] sm:$0xff]  ;;  %v175_v3 = vmul.f32 %v1081_v0, %v1081_v0  ;;  %v173_v4 = vmul.f32 %v1084_v1, %v1084_v1  ;;  %v1096_v6 = vld [vmem:[%s1074_s24 + $0x28] sm:$0xff]  ;;  %v1099_v7 = vld [vmem:[%s1074_s24 + $0x18] sm:$0xff]  ;;  %s663_s28 = scalar_lea.hbm %s1669_s1, %s755_s25  ;;  %s664_s10 = sshll.u32 %s1279_s17, 4  ;;  %s665_s10 = int_to_ptr.vmem [resolvable:$true] %s664_s10 }
  0x2b   : > { %v171_v5 = vmul.f32 %v1087_v2, %v1087_v2  ;;  %v1102_v8 = vld [vmem:[%s1074_s24 + $0x8] sm:$0xff]  ;;  %v176_v9 = vmul.f32 %v1096_v6, %v1096_v6  ;;  %v174_v10 = vmul.f32 %v1099_v7, %v1099_v7  ;;  %v1111_v12 = vld [vmem:[%s1074_s24 + $0x40] sm:$0xff]  ;;  %v1114_v13 = vld [vmem:[%s1074_s24 + $0x38] sm:$0xff]  ;;  %s666_s29 = sshll.u32 %s663_s28, 4  ;;  %s652_s30 = scalar_lea.sflag [#allocation4], %s1068_s21  ;;  %s667_s29 = int_to_ptr.hbm [resolvable:$true] %s666_s29 }
  0x2c   : > { %211 = vadd.xlane.f32.xlu2 %v175_v3  ;;  %207 = vadd.xlane.f32.xlu1 %v173_v4  ;;  %v172_v11 = vmul.f32 %v1102_v8, %v1102_v8  ;;  %v1117_v14 = vld [vmem:[%s1074_s24 + $0x30] sm:$0xff]  ;;  %v179_v15 = vmul.f32 %v1111_v12, %v1111_v12  ;;  %v178_v16 = vmul.f32 %v1114_v13, %v1114_v13  ;;  %v1126_v18 = vld [vmem:[%s1074_s24 + $0x58] sm:$0xff]  ;;  %v1132_v20 = vld [vmem:[%s1074_s24 + $0x48] sm:$0xff]  ;;  %s914_s2 = sshra.s32 %s667_s29, 4  ;;  %s920_s11 = scalar_lea.hbm %s1669_s1, 512  ;;  %s915_s2 = int_to_ptr.hbm [resolvable:$true] %s914_s2 }
  0x2d   : > { %203 = vadd.xlane.f32.xlu0 %v171_v5  ;;  %v177_v17 = vmul.f32 %v1117_v14, %v1117_v14  ;;  %v1129_v19 = vld [vmem:[%s1074_s24 + $0x50] sm:$0xff]  ;;  %v182_v21 = vmul.f32 %v1126_v18, %v1126_v18  ;;  %v180_v23 = vmul.f32 %v1132_v20, %v1132_v20  ;;  %v1144_v25 = vld [vmem:[%s1074_s24 + $0x68] sm:$0xff]  ;;  %v1147_v26 = vld [vmem:[%s1074_s24 + $0x60] sm:$0xff]  ;;  %s916_s3 = scalar_lea.hbm %s915_s2, 256  ;;  %p921_p0 = scmp.lt.s32.totalorder %s915_s2, %s1669_s1 }
  0x2e   : > { %v181_v22 = vmul.f32 %v1129_v19, %v1129_v19  ;;  %v1141_v24 = vld [vmem:[%s1074_s24 + $0x70] sm:$0xff]  ;;  %v184_v28 = vmul.f32 %v1144_v25, %v1144_v25  ;;  %v183_v29 = vmul.f32 %v1147_v26, %v1147_v26  ;;  %v1156_v30 = vld [vmem:[%s1074_s24 + $0x88] sm:$0xff]  ;;  %v1159_v31 = vld [vmem:[%s1074_s24 + $0x80] sm:$0xff]  ;;  %p917_p6 = scmp.ne.s32.totalorder %s915_s2, %s916_s3  ;;  %p922_p1 = scmp.lt.s32.totalorder %s920_s11, %s916_s3 }
  0x2f   : > { %v185_v27 = vmul.f32 %v1141_v24, %v1141_v24  ;;  %v1162_v32 = vld [vmem:[%s1074_s24 + $0x78] sm:$0xff]  ;;  %v188_v33 = vmul.f32 %v1156_v30, %v1156_v30  ;;  %v187_v34 = vmul.f32 %v1159_v31, %v1159_v31  ;;  %v1171_v36 = vld [vmem:[%s1074_s24 + $0xa0] sm:$0xff]  ;;  %v1177_v38 = vld [vmem:[%s1074_s24 + $0x90] sm:$0xff] }
  0x30   : > { %v186_v35 = vmul.f32 %v1162_v32, %v1162_v32  ;;  %v1174_v37 = vld [vmem:[%s1074_s24 + $0x98] sm:$0xff]  ;;  %v191_v39 = vmul.f32 %v1171_v36, %v1171_v36  ;;  %v189_v41 = vmul.f32 %v1177_v38, %v1177_v38  ;;  %v1189_v43 = vld [vmem:[%s1074_s24 + $0xb0] sm:$0xff]  ;;  %v1192_v44 = vld [vmem:[%s1074_s24 + $0xa8] sm:$0xff]  ;;  %p918_p9 = pnand %p917_p6, %p1032_p11  ;;  %p923_p3 = por %p922_p1, %p921_p0 }
  0x31   : > { %v190_v40 = vmul.f32 %v1174_v37, %v1174_v37  ;;  %v1186_v42 = vld [vmem:[%s1074_s24 + $0xb8] sm:$0xff]  ;;  %v193_v46 = vmul.f32 %v1189_v43, %v1189_v43  ;;  %v192_v47 = vmul.f32 %v1192_v44, %v1192_v44  ;;  %v1201_v48 = vld [vmem:[%s1074_s24 + $0xd0] sm:$0xff]  ;;  %v1204_v49 = vld [vmem:[%s1074_s24 + $0xc8] sm:$0xff] }
  0x32   : > { %v194_v45 = vmul.f32 %v1186_v42, %v1186_v42  ;;  %v1207_v50 = vld [vmem:[%s1074_s24 + $0xc0] sm:$0xff]  ;;  %v197_v51 = vmul.f32 %v1201_v48, %v1201_v48  ;;  %v196_v52 = vmul.f32 %v1204_v49, %v1204_v49  ;;  %v1216_v54 = vld [vmem:[%s1074_s24 + $0xe8] sm:$0xff]  ;;  %v1222_v56 = vld [vmem:[%s1074_s24 + $0xd8] sm:$0xff]  ;;  %p919_p13 = pneg %p918_p9 }
  0x33   : > { %v195_v53 = vmul.f32 %v1207_v50, %v1207_v50  ;;  %v1219_v55 = vld [vmem:[%s1074_s24 + $0xe0] sm:$0xff]  ;;  %v200_v57 = vmul.f32 %v1216_v54, %v1216_v54  ;;  %v198_v59 = vmul.f32 %v1222_v56, %v1222_v56  ;;  %v1231_v60 = vld [vmem:[%s1074_s24 + $0xf8] sm:$0xff]  ;;  %v1234_v61 = vld [vmem:[%s1074_s24 + $0xf0] sm:$0xff] }
  0x34   : > { %213 = vadd.xlane.f32.xlu2 %v176_v9  ;;  %209 = vadd.xlane.f32.xlu1 %v174_v10  ;;  %v199_v58 = vmul.f32 %v1219_v55, %v1219_v55  ;;  %v202_v62 = vmul.f32 %v1231_v60, %v1231_v60  ;;  %v201_v63 = vmul.f32 %v1234_v61, %v1234_v61  ;;  %p924_p4 = pnand %p923_p3, %p919_p13 }
  0x35   : > { %205 = vadd.xlane.f32.xlu0 %v172_v11 }
  0x3c   : > { %219 = vadd.xlane.f32.xlu2 %v179_v15  ;;  %217 = vadd.xlane.f32.xlu1 %v178_v16 }
  0x3d   : > { %215 = vadd.xlane.f32.xlu0 %v177_v17 }
  0x44   : > { %225 = vadd.xlane.f32.xlu2 %v182_v21  ;;  %223 = vadd.xlane.f32.xlu1 %v181_v22 }
  0x45   : > { %221 = vadd.xlane.f32.xlu0 %v180_v23 }
  0x4c   : > { %231 = vadd.xlane.f32.xlu2 %v185_v27  ;;  %229 = vadd.xlane.f32.xlu1 %v184_v28 }
  0x4d   : > { %227 = vadd.xlane.f32.xlu0 %v183_v29 }
  0x54   : > { %237 = vadd.xlane.f32.xlu2 %v188_v33  ;;  %235 = vadd.xlane.f32.xlu1 %v187_v34 }
  0x55   : > { %233 = vadd.xlane.f32.xlu0 %v186_v35 }
  0x5c   : > { %243 = vadd.xlane.f32.xlu2 %v191_v39  ;;  %241 = vadd.xlane.f32.xlu1 %v190_v40 }
  0x5d   : > { %239 = vadd.xlane.f32.xlu0 %v189_v41 }
  0x64   : > { %249 = vadd.xlane.f32.xlu2 %v194_v45  ;;  %247 = vadd.xlane.f32.xlu1 %v193_v46 }
  0x65   : > { %245 = vadd.xlane.f32.xlu0 %v192_v47 }
  0x6c   : > { %255 = vadd.xlane.f32.xlu2 %v197_v51  ;;  %253 = vadd.xlane.f32.xlu1 %v196_v52 }
  0x6d   : > { %251 = vadd.xlane.f32.xlu0 %v195_v53 }
  0x74   : > { %261 = vadd.xlane.f32.xlu2 %v200_v57  ;;  %259 = vadd.xlane.f32.xlu1 %v199_v58 }
  0x75   : > { %257 = vadd.xlane.f32.xlu0 %v198_v59 }
  0x7c   : > { %265 = vadd.xlane.f32.xlu1 %v202_v62 }
  0x7d   : > { %263 = vadd.xlane.f32.xlu0 %v201_v63 }
  0x9f   : > { %v212_v3 = vpop.xlane.xlu2 %211  ;;  %v208_v4 = vpop.xlane.xlu1 %207 }
  0xa0   : > { %806 = vrsqrt.f32 %v212_v3  ;;  %v204_v5 = vpop.xlane.xlu0 %203  ;;  %vm313_vm0 = vweird.f32 %v212_v3  ;;  %vm293_vm2 = vweird.f32 %v208_v4 }
  0xa1   : > { %808 = vrsqrt.f32 %v208_v4  ;;  %vm273_vm6 = vweird.f32 %v204_v5 }
  0xa2   : > { %810 = vrsqrt.f32 %v204_v5 }
  0xa6   : > { %v807_v9 = vpop.eup %806 }
  0xa7   : > { %v809_v10 = vpop.eup %808  ;;  %v308_v11 = vmul.f32 %v807_v9, %v212_v3  ;;  %v1240_v15 = vpop.xlane.xlu2 %213  ;;  %vm314_vm1 = vweird.f32 %v807_v9 }
  0xa8   : > { %v1242_v16 = vpop.xlane.xlu1 %209  ;;  %v811_v17 = vpop.eup %810  ;;  %v288_v21 = vmul.f32 %v809_v10, %v208_v4  ;;  %812 = vrsqrt.f32 %v1240_v15  ;;  %vm294_vm3 = vweird.f32 %v809_v10  ;;  %vm315_vm5 = vmor %vm313_vm0, %vm314_vm1  ;;  %vm323_vm9 = vweird.f32 %v1240_v15 }
  0xa9   : > { %v1245_v22 = vpop.xlane.xlu0 %205  ;;  %v309_v23 = vmul.f32 %v807_v9, %v308_v11  ;;  %v268_v27 = vmul.f32 %v811_v17, %v204_v5  ;;  %814 = vrsqrt.f32 %v1242_v16  ;;  %vm274_vm4 = vweird.f32 %v811_v17  ;;  %vm295_vm7 = vmor %vm293_vm2, %vm294_vm3 }
  0xaa   : > { %v289_v28 = vmul.f32 %v809_v10, %v288_v21  ;;  %816 = vrsqrt.f32 %v1245_v22  ;;  %vm275_vm8 = vmor %vm273_vm6, %vm274_vm4  ;;  %vm303_vm14 = vweird.f32 %v1242_v16  ;;  %vm283_vm15 = vweird.f32 %v1245_v22 }
  0xab   : > { %v310_v29 = vmul.f32 0.5, %v309_v23  ;;  %v269_v33 = vmul.f32 %v811_v17, %v268_v27 }
  0xac   : > { %v290_v34 = vmul.f32 0.5, %v289_v28 }
  0xad   : > { %v311_v35 = vsub.f32 1.5, %v310_v29  ;;  %v270_v39 = vmul.f32 0.5, %v269_v33 }
  0xae   : > { %v1249_v40 = vpop.eup %812  ;;  %v291_v41 = vsub.f32 1.5, %v290_v34 }
  0xaf   : > { %v1251_v45 = vpop.eup %814  ;;  %v312_v46 = vmul.f32 %v807_v9, %v311_v35  ;;  %v271_v47 = vsub.f32 1.5, %v270_v39  ;;  %v318_v51 = vmul.f32 %v1249_v40, %v1240_v15  ;;  %v1255_v52 = vpop.xlane.xlu2 %219  ;;  %vm324_vm10 = vweird.f32 %v1249_v40 }
  0xb0   : > { %v1257_v53 = vpop.xlane.xlu1 %217  ;;  %v1259_v57 = vpop.eup %816  ;;  %v292_v58 = vmul.f32 %v809_v10, %v291_v41  ;;  %v298_v59 = vmul.f32 %v1251_v45, %v1242_v16  ;;  %818 = vrsqrt.f32 %v1255_v52  ;;  %vm304_vm11 = vweird.f32 %v1251_v45  ;;  %vm325_vm13 = vmor %vm323_vm9, %vm324_vm10 }
  0xb1   : > { %v1265_v62 = vpop.xlane.xlu0 %215  ;;  %v316_v63 = vsel %vm315_vm5, %v807_v9, %v312_v46  ;;  %v272_v11 = vmul.f32 %v811_v17, %v271_v47  ;;  %v319_v21 = vmul.f32 %v1249_v40, %v318_v51  ;;  %v278_v3 = vmul.f32 %v1259_v57, %v1245_v22  ;;  %vm305_vm0 = vmor %vm303_vm14, %vm304_vm11 }
  0xb2   : > { %v591_v5 = vmul.f32 %v316_v63, %v1081_v0  ;;  %v296_v23 = vsel %vm295_vm7, %v809_v10, %v292_v58  ;;  %v299_v27 = vmul.f32 %v1251_v45, %v298_v59  ;;  %820 = vrsqrt.f32 %v1257_v53 }
  0xb3   : > { %v589_v28 = vmul.f32 %v296_v23, %v1084_v1  ;;  %v276_v29 = vsel %vm275_vm8, %v811_v17, %v272_v11  ;;  %v320_v9 = vmul.f32 0.5, %v319_v21  ;;  %v279_v4 = vmul.f32 %v1259_v57, %v278_v3 }
  0xb4   : > { %623 = vst [vmem:[%s1279_s17 + $0x20] sm:$0xff] %v591_v5  ;;  %v587_v0 = vmul.f32 %v276_v29, %v1087_v2  ;;  %v300_v10 = vmul.f32 0.5, %v299_v27  ;;  %822 = vrsqrt.f32 %v1265_v62  ;;  %vm284_vm12 = vweird.f32 %v1259_v57 }
  0xb5   : > { %621 = vst [vmem:[%s1279_s17 + $0x10] sm:$0xff] %v589_v28  ;;  %v321_v1 = vsub.f32 1.5, %v320_v9  ;;  %v280_v17 = vmul.f32 0.5, %v279_v4  ;;  %vm285_vm1 = vmor %vm283_vm15, %vm284_vm12  ;;  %vm353_vm2 = vweird.f32 %v1255_v52  ;;  %vm343_vm4 = vweird.f32 %v1257_v53 }
  0xb6   : > { %v1288_v33 = vpop.eup %818  ;;  %619 = vst [vmem:[%s1279_s17] sm:$0xff] %v587_v0  ;;  %v301_v34 = vsub.f32 1.5, %v300_v10  ;;  %vm333_vm5 = vweird.f32 %v1265_v62 }
  0xb7   : > { %v322_v2 = vmul.f32 %v1249_v40, %v321_v1  ;;  %v281_v35 = vsub.f32 1.5, %v280_v17  ;;  %v348_v39 = vmul.f32 %v1288_v33, %v1255_v52  ;;  %v1296_v41 = vpop.xlane.xlu2 %225  ;;  %vm354_vm3 = vweird.f32 %v1288_v33 }
  0xb8   : > { %v1298_v46 = vpop.xlane.xlu1 %223  ;;  %v302_v47 = vmul.f32 %v1251_v45, %v301_v34  ;;  %824 = vrsqrt.f32 %v1296_v41  ;;  %v821_v63 = vpop.eup %820  ;;  %vm383_vm6 = vweird.f32 %v1296_v41  ;;  %vm355_vm7 = vmor %vm353_vm2, %vm354_vm3 }
  0xb9   : > { %v1306_v51 = vpop.xlane.xlu0 %221  ;;  %v326_v58 = vsel %vm325_vm13, %v1249_v40, %v322_v2  ;;  %v282_v59 = vmul.f32 %v1259_v57, %v281_v35  ;;  %v349_v15 = vmul.f32 %v1288_v33, %v348_v39  ;;  %826 = vrsqrt.f32 %v1298_v46 }
  0xba   : > { %v592_v16 = vmul.f32 %v326_v58, %v1096_v6  ;;  %v306_v22 = vsel %vm305_vm0, %v1251_v45, %v302_v47  ;;  %828 = vrsqrt.f32 %v1306_v51  ;;  %v823_v40 = vpop.eup %822  ;;  %v338_v5 = vmul.f32 %v821_v63, %v1257_v53 }
  0xbb   : > { %v590_v11 = vmul.f32 %v306_v22, %v1099_v7  ;;  %v286_v21 = vsel %vm285_vm1, %v1259_v57, %v282_v59  ;;  %v350_v3 = vmul.f32 0.5, %v349_v15  ;;  %v328_v6 = vmul.f32 %v823_v40, %v1265_v62 }
  0xbc   : > { %624 = vst [vmem:[%s1279_s17 + $0x28] sm:$0xff] %v592_v16  ;;  %v588_v23 = vmul.f32 %v286_v21, %v1102_v8  ;;  %v339_v27 = vmul.f32 %v821_v63, %v338_v5  ;;  %vm344_vm8 = vweird.f32 %v821_v63  ;;  %vm334_vm9 = vweird.f32 %v823_v40 }
  0xbd   : > { %622 = vst [vmem:[%s1279_s17 + $0x18] sm:$0xff] %v590_v11  ;;  %v351_v45 = vsub.f32 1.5, %v350_v3  ;;  %v329_v7 = vmul.f32 %v823_v40, %v328_v6  ;;  %vm345_vm11 = vmor %vm343_vm4, %vm344_vm8  ;;  %vm373_vm0 = vweird.f32 %v1298_v46  ;;  %vm363_vm1 = vweird.f32 %v1306_v51 }
  0xbe   : > { %v1326_v28 = vpop.eup %824  ;;  %620 = vst [vmem:[%s1279_s17 + $0x8] sm:$0xff] %v588_v23  ;;  %v340_v29 = vmul.f32 0.5, %v339_v27  ;;  %vm335_vm13 = vmor %vm333_vm5, %vm334_vm9 }
  0xbf   : > { %v1331_v57 = vpop.eup %826  ;;  %v352_v8 = vmul.f32 %v1288_v33, %v351_v45  ;;  %v378_v9 = vmul.f32 %v1326_v28, %v1296_v41  ;;  %v1337_v4 = vpop.xlane.xlu2 %231  ;;  %v330_v1 = vmul.f32 0.5, %v329_v7  ;;  %vm384_vm10 = vweird.f32 %v1326_v28 }
  0xc0   : > { %v1339_v0 = vpop.xlane.xlu1 %229  ;;  %v1341_v10 = vpop.eup %828  ;;  %v368_v17 = vmul.f32 %v1331_v57, %v1298_v46  ;;  %830 = vrsqrt.f32 %v1337_v4  ;;  %v341_v35 = vsub.f32 1.5, %v340_v29  ;;  %vm374_vm12 = vweird.f32 %v1331_v57  ;;  %vm385_vm15 = vmor %vm383_vm6, %vm384_vm10 }
  0xc1   : > { %v1350_v34 = vpop.xlane.xlu0 %227  ;;  %v356_v2 = vsel %vm355_vm7, %v1288_v33, %v352_v8  ;;  %v379_v39 = vmul.f32 %v1326_v28, %v378_v9  ;;  %v358_v47 = vmul.f32 %v1341_v10, %v1306_v51  ;;  %v331_v58 = vsub.f32 1.5, %v330_v1  ;;  %vm375_vm2 = vmor %vm373_vm0, %vm374_vm12 }
  0xc2   : > { %v595_v52 = vmul.f32 %v356_v2, %v1111_v12  ;;  %v369_v59 = vmul.f32 %v1331_v57, %v368_v17  ;;  %v342_v15 = vmul.f32 %v821_v63, %v341_v35  ;;  %832 = vrsqrt.f32 %v1339_v0 }
  0xc3   : > { %v380_v16 = vmul.f32 0.5, %v379_v39  ;;  %v359_v22 = vmul.f32 %v1341_v10, %v358_v47  ;;  %v332_v33 = vmul.f32 %v823_v40, %v331_v58  ;;  %834 = vrsqrt.f32 %v1350_v34 }
  0xc4   : > { %627 = vst [vmem:[%s1279_s17 + $0x40] sm:$0xff] %v595_v52  ;;  %v370_v11 = vmul.f32 0.5, %v369_v59  ;;  %v346_v12 = vsel %vm345_vm11, %v821_v63, %v342_v15  ;;  %vm364_vm14 = vweird.f32 %v1341_v10  ;;  %vm413_vm4 = vweird.f32 %v1337_v4 }
  0xc5   : > { %v381_v21 = vsub.f32 1.5, %v380_v16  ;;  %v360_v3 = vmul.f32 0.5, %v359_v22  ;;  %v594_v53 = vmul.f32 %v346_v12, %v1114_v13  ;;  %v336_v23 = vsel %vm335_vm13, %v823_v40, %v332_v33  ;;  %vm365_vm3 = vmor %vm363_vm1, %vm364_vm14 }
  0xc6   : > { %v1369_v5 = vpop.eup %830  ;;  %v371_v6 = vsub.f32 1.5, %v370_v11  ;;  %v593_v45 = vmul.f32 %v336_v23, %v1117_v14  ;;  %vm403_vm6 = vweird.f32 %v1339_v0  ;;  %vm393_vm7 = vweird.f32 %v1350_v34 }
  0xc7   : > { %v382_v63 = vmul.f32 %v1326_v28, %v381_v21  ;;  %v361_v62 = vsub.f32 1.5, %v360_v3  ;;  %v408_v27 = vmul.f32 %v1369_v5, %v1337_v4  ;;  %v1377_v7 = vpop.xlane.xlu2 %237  ;;  %626 = vst [vmem:[%s1279_s17 + $0x38] sm:$0xff] %v594_v53  ;;  %vm414_vm5 = vweird.f32 %v1369_v5 }
  0xc8   : > { %v1379_v8 = vpop.xlane.xlu1 %235  ;;  %v372_v13 = vmul.f32 %v1331_v57, %v371_v6  ;;  %836 = vrsqrt.f32 %v1377_v7  ;;  %625 = vst [vmem:[%s1279_s17 + $0x30] sm:$0xff] %v593_v45  ;;  %v833_v46 = vpop.eup %832  ;;  %vm443_vm8 = vweird.f32 %v1377_v7  ;;  %vm415_vm9 = vmor %vm413_vm4, %vm414_vm5 }
  0xc9   : > { %v1390_v14 = vpop.xlane.xlu0 %233  ;;  %v386_v40 = vsel %vm385_vm15, %v1326_v28, %v382_v63  ;;  %v362_v41 = vmul.f32 %v1341_v10, %v361_v62  ;;  %v409_v29 = vmul.f32 %v1369_v5, %v408_v27  ;;  %838 = vrsqrt.f32 %v1379_v8  ;;  %v835_v28 = vpop.eup %834 }
  0xca   : > { %v598_v51 = vmul.f32 %v386_v40, %v1126_v18  ;;  %v376_v9 = vsel %vm375_vm2, %v1331_v57, %v372_v13  ;;  %840 = vrsqrt.f32 %v1390_v14  ;;  %v398_v35 = vmul.f32 %v833_v46, %v1339_v0 }
  0xcb   : > { %v597_v1 = vmul.f32 %v376_v9, %v1129_v19  ;;  %v366_v17 = vsel %vm365_vm3, %v1341_v10, %v362_v41  ;;  %v410_v2 = vmul.f32 0.5, %v409_v29  ;;  %v388_v18 = vmul.f32 %v835_v28, %v1350_v34 }
  0xcc   : > { %630 = vst [vmem:[%s1279_s17 + $0x58] sm:$0xff] %v598_v51  ;;  %v596_v39 = vmul.f32 %v366_v17, %v1132_v20  ;;  %v399_v47 = vmul.f32 %v833_v46, %v398_v35  ;;  %vm404_vm10 = vweird.f32 %v833_v46  ;;  %vm394_vm11 = vweird.f32 %v835_v28 }
  0xcd   : > { %629 = vst [vmem:[%s1279_s17 + $0x50] sm:$0xff] %v597_v1  ;;  %v411_v57 = vsub.f32 1.5, %v410_v2  ;;  %v389_v19 = vmul.f32 %v835_v28, %v388_v18  ;;  %vm405_vm13 = vmor %vm403_vm6, %vm404_vm10  ;;  %vm433_vm2 = vweird.f32 %v1379_v8  ;;  %vm423_vm3 = vweird.f32 %v1390_v14 }
  0xce   : > { %v1413_v52 = vpop.eup %836  ;;  %628 = vst [vmem:[%s1279_s17 + $0x48] sm:$0xff] %v596_v39  ;;  %v400_v58 = vmul.f32 0.5, %v399_v47  ;;  %vm395_vm15 = vmor %vm393_vm7, %vm394_vm11 }
  0xcf   : > { %v1418_v10 = vpop.eup %838  ;;  %v412_v20 = vmul.f32 %v1369_v5, %v411_v57  ;;  %v438_v59 = vmul.f32 %v1413_v52, %v1377_v7  ;;  %v1424_v15 = vpop.xlane.xlu2 %243  ;;  %v390_v33 = vmul.f32 0.5, %v389_v19  ;;  %vm444_vm12 = vweird.f32 %v1413_v52 }
  0xd0   : > { %v1426_v16 = vpop.xlane.xlu1 %241  ;;  %v1428_v22 = vpop.eup %840  ;;  %v428_v11 = vmul.f32 %v1418_v10, %v1379_v8  ;;  %842 = vrsqrt.f32 %v1424_v15  ;;  %v401_v3 = vsub.f32 1.5, %v400_v58  ;;  %vm434_vm14 = vweird.f32 %v1418_v10  ;;  %vm445_vm1 = vmor %vm443_vm8, %vm444_vm12 }
  0xd1   : > { %v1437_v12 = vpop.xlane.xlu0 %239  ;;  %v416_v21 = vsel %vm415_vm9, %v1369_v5, %v412_v20  ;;  %v439_v53 = vmul.f32 %v1413_v52, %v438_v59  ;;  %v418_v23 = vmul.f32 %v1428_v22, %v1390_v14  ;;  %v391_v6 = vsub.f32 1.5, %v390_v33  ;;  %vm435_vm4 = vmor %vm433_vm2, %vm434_vm14 }
  0xd2   : > { %v601_v4 = vmul.f32 %v416_v21, %v1141_v24  ;;  %v429_v45 = vmul.f32 %v1418_v10, %v428_v11  ;;  %v402_v63 = vmul.f32 %v833_v46, %v401_v3  ;;  %844 = vrsqrt.f32 %v1426_v16 }
  0xd3   : > { %v440_v62 = vmul.f32 0.5, %v439_v53  ;;  %v419_v27 = vmul.f32 %v1428_v22, %v418_v23  ;;  %v392_v5 = vmul.f32 %v835_v28, %v391_v6  ;;  %846 = vrsqrt.f32 %v1437_v12 }
  0xd4   : > { %633 = vst [vmem:[%s1279_s17 + $0x70] sm:$0xff] %v601_v4  ;;  %v430_v13 = vmul.f32 0.5, %v429_v45  ;;  %v406_v24 = vsel %vm405_vm13, %v833_v46, %v402_v63  ;;  %vm424_vm0 = vweird.f32 %v1428_v22  ;;  %vm473_vm6 = vweird.f32 %v1424_v15 }
  0xd5   : > { %v441_v40 = vsub.f32 1.5, %v440_v62  ;;  %v420_v41 = vmul.f32 0.5, %v419_v27  ;;  %v600_v0 = vmul.f32 %v406_v24, %v1144_v25  ;;  %v396_v51 = vsel %vm395_vm15, %v835_v28, %v392_v5  ;;  %vm425_vm5 = vmor %vm423_vm3, %vm424_vm0 }
  0xd6   : > { %v1456_v29 = vpop.eup %842  ;;  %v431_v9 = vsub.f32 1.5, %v430_v13  ;;  %v599_v1 = vmul.f32 %v396_v51, %v1147_v26  ;;  %vm463_vm8 = vweird.f32 %v1426_v16  ;;  %vm453_vm9 = vweird.f32 %v1437_v12 }
  0xd7   : > { %v442_v46 = vmul.f32 %v1413_v52, %v441_v40  ;;  %v421_v34 = vsub.f32 1.5, %v420_v41  ;;  %v468_v17 = vmul.f32 %v1456_v29, %v1424_v15  ;;  %v1464_v2 = vpop.xlane.xlu2 %249  ;;  %632 = vst [vmem:[%s1279_s17 + $0x68] sm:$0xff] %v600_v0  ;;  %vm474_vm7 = vweird.f32 %v1456_v29 }
  0xd8   : > { %v1466_v35 = vpop.xlane.xlu1 %247  ;;  %v432_v25 = vmul.f32 %v1418_v10, %v431_v9  ;;  %848 = vrsqrt.f32 %v1464_v2  ;;  %631 = vst [vmem:[%s1279_s17 + $0x60] sm:$0xff] %v599_v1  ;;  %v845_v8 = vpop.eup %844  ;;  %vm503_vm10 = vweird.f32 %v1464_v2  ;;  %vm475_vm11 = vmor %vm473_vm6, %vm474_vm7 }
  0xd9   : > { %v1477_v26 = vpop.xlane.xlu0 %245  ;;  %v446_v28 = vsel %vm445_vm1, %v1413_v52, %v442_v46  ;;  %v422_v7 = vmul.f32 %v1428_v22, %v421_v34  ;;  %v469_v39 = vmul.f32 %v1456_v29, %v468_v17  ;;  %850 = vrsqrt.f32 %v1466_v35  ;;  %v847_v57 = vpop.eup %846 }
  0xda   : > { %v604_v14 = vmul.f32 %v446_v28, %v1156_v30  ;;  %v436_v18 = vsel %vm435_vm4, %v1418_v10, %v432_v25  ;;  %852 = vrsqrt.f32 %v1477_v26  ;;  %v458_v20 = vmul.f32 %v845_v8, %v1426_v16 }
  0xdb   : > { %v603_v47 = vmul.f32 %v436_v18, %v1159_v31  ;;  %v426_v52 = vsel %vm425_vm5, %v1428_v22, %v422_v7  ;;  %v470_v19 = vmul.f32 0.5, %v469_v39  ;;  %v448_v30 = vmul.f32 %v847_v57, %v1437_v12 }
  0xdc   : > { %636 = vst [vmem:[%s1279_s17 + $0x88] sm:$0xff] %v604_v14  ;;  %v602_v58 = vmul.f32 %v426_v52, %v1162_v32  ;;  %v459_v59 = vmul.f32 %v845_v8, %v458_v20  ;;  %vm464_vm12 = vweird.f32 %v845_v8  ;;  %vm454_vm13 = vweird.f32 %v847_v57 }
  0xdd   : > { %635 = vst [vmem:[%s1279_s17 + $0x80] sm:$0xff] %v603_v47  ;;  %v471_v10 = vsub.f32 1.5, %v470_v19  ;;  %v449_v31 = vmul.f32 %v847_v57, %v448_v30  ;;  %vm465_vm15 = vmor %vm463_vm8, %vm464_vm12  ;;  %vm493_vm4 = vweird.f32 %v1466_v35  ;;  %vm483_vm5 = vweird.f32 %v1477_v26 }
  0xde   : > { %v1500_v33 = vpop.eup %848  ;;  %634 = vst [vmem:[%s1279_s17 + $0x78] sm:$0xff] %v602_v58  ;;  %v460_v11 = vmul.f32 0.5, %v459_v59  ;;  %vm455_vm1 = vmor %vm453_vm9, %vm454_vm13 }
  0xdf   : > { %v1505_v22 = vpop.eup %850  ;;  %v472_v32 = vmul.f32 %v1456_v29, %v471_v10  ;;  %v498_v21 = vmul.f32 %v1500_v33, %v1464_v2  ;;  %v1511_v3 = vpop.xlane.xlu2 %255  ;;  %v450_v4 = vmul.f32 0.5, %v449_v31  ;;  %vm504_vm14 = vweird.f32 %v1500_v33 }
  0xe0   : > { %v1513_v53 = vpop.xlane.xlu1 %253  ;;  %v1515_v23 = vpop.eup %852  ;;  %v488_v6 = vmul.f32 %v1505_v22, %v1466_v35  ;;  %854 = vrsqrt.f32 %v1511_v3  ;;  %v461_v62 = vsub.f32 1.5, %v460_v11  ;;  %vm494_vm0 = vweird.f32 %v1505_v22  ;;  %vm505_vm3 = vmor %vm503_vm10, %vm504_vm14 }
  0xe1   : > { %v1524_v45 = vpop.xlane.xlu0 %251  ;;  %v476_v63 = vsel %vm475_vm11, %v1456_v29, %v472_v32  ;;  %v499_v27 = vmul.f32 %v1500_v33, %v498_v21  ;;  %v478_v5 = vmul.f32 %v1515_v23, %v1477_v26  ;;  %v451_v13 = vsub.f32 1.5, %v450_v4  ;;  %vm495_vm6 = vmor %vm493_vm4, %vm494_vm0 }
  0xe2   : > { %v607_v15 = vmul.f32 %v476_v63, %v1171_v36  ;;  %v489_v24 = vmul.f32 %v1505_v22, %v488_v6  ;;  %v462_v40 = vmul.f32 %v845_v8, %v461_v62  ;;  %856 = vrsqrt.f32 %v1513_v53 }
  0xe3   : > { %v500_v41 = vmul.f32 0.5, %v499_v27  ;;  %v479_v0 = vmul.f32 %v1515_v23, %v478_v5  ;;  %v452_v29 = vmul.f32 %v847_v57, %v451_v13  ;;  %858 = vrsqrt.f32 %v1524_v45 }
  0xe4   : > { %639 = vst [vmem:[%s1279_s17 + $0xa0] sm:$0xff] %v607_v15  ;;  %v490_v51 = vmul.f32 0.5, %v489_v24  ;;  %v466_v36 = vsel %vm465_vm15, %v845_v8, %v462_v40  ;;  %vm484_vm2 = vweird.f32 %v1515_v23  ;;  %vm533_vm8 = vweird.f32 %v1511_v3 }
  0xe5   : > { %v501_v9 = vsub.f32 1.5, %v500_v41  ;;  %v480_v1 = vmul.f32 0.5, %v479_v0  ;;  %v606_v16 = vmul.f32 %v466_v36, %v1174_v37  ;;  %v456_v34 = vsel %vm455_vm1, %v847_v57, %v452_v29  ;;  %vm485_vm7 = vmor %vm483_vm5, %vm484_vm2 }
  0xe6   : > { %v1543_v46 = vpop.eup %854  ;;  %v491_v17 = vsub.f32 1.5, %v490_v51  ;;  %v605_v25 = vmul.f32 %v456_v34, %v1177_v38  ;;  %vm523_vm10 = vweird.f32 %v1513_v53  ;;  %vm513_vm11 = vweird.f32 %v1524_v45 }
  0xe7   : > { %v502_v28 = vmul.f32 %v1500_v33, %v501_v9  ;;  %v481_v12 = vsub.f32 1.5, %v480_v1  ;;  %v528_v7 = vmul.f32 %v1543_v46, %v1511_v3  ;;  %v1551_v39 = vpop.xlane.xlu2 %261  ;;  %638 = vst [vmem:[%s1279_s17 + $0x98] sm:$0xff] %v606_v16  ;;  %vm534_vm9 = vweird.f32 %v1543_v46 }
  0xe8   : > { %v1553_v8 = vpop.xlane.xlu1 %259  ;;  %v492_v37 = vmul.f32 %v1505_v22, %v491_v17  ;;  %860 = vrsqrt.f32 %v1551_v39  ;;  %637 = vst [vmem:[%s1279_s17 + $0x90] sm:$0xff] %v605_v25  ;;  %v857_v35 = vpop.eup %856  ;;  %vm535_vm12 = vmor %vm533_vm8, %vm534_vm9  ;;  %vm563_vm15 = vweird.f32 %v1551_v39 }
  0xe9   : > { %v1564_v38 = vpop.xlane.xlu0 %257  ;;  %v506_v14 = vsel %vm505_vm3, %v1500_v33, %v502_v28  ;;  %v482_v2 = vmul.f32 %v1515_v23, %v481_v12  ;;  %v529_v18 = vmul.f32 %v1543_v46, %v528_v7  ;;  %862 = vrsqrt.f32 %v1553_v8  ;;  %v859_v47 = vpop.eup %858 }
  0xea   : > { %v610_v26 = vmul.f32 %v506_v14, %v1186_v42  ;;  %v496_v57 = vsel %vm495_vm6, %v1505_v22, %v492_v37  ;;  %864 = vrsqrt.f32 %v1564_v38  ;;  %v518_v58 = vmul.f32 %v857_v35, %v1513_v53 }
  0xeb   : > { %v609_v52 = vmul.f32 %v496_v57, %v1189_v43  ;;  %v486_v19 = vsel %vm485_vm7, %v1515_v23, %v482_v2  ;;  %v530_v20 = vmul.f32 0.5, %v529_v18  ;;  %v508_v42 = vmul.f32 %v859_v47, %v1524_v45 }
  0xec   : > { %642 = vst [vmem:[%s1279_s17 + $0xb8] sm:$0xff] %v610_v26  ;;  %v608_v30 = vmul.f32 %v486_v19, %v1192_v44  ;;  %v519_v59 = vmul.f32 %v857_v35, %v518_v58  ;;  %vm524_vm13 = vweird.f32 %v857_v35  ;;  %vm514_vm14 = vweird.f32 %v859_v47 }
  0xed   : > { %641 = vst [vmem:[%s1279_s17 + $0xb0] sm:$0xff] %v609_v52  ;;  %v531_v10 = vsub.f32 1.5, %v530_v20  ;;  %v509_v43 = vmul.f32 %v859_v47, %v508_v42  ;;  %vm525_vm0 = vmor %vm523_vm10, %vm524_vm13  ;;  %vm553_vm6 = vweird.f32 %v1553_v8  ;;  %vm543_vm8 = vweird.f32 %v1564_v38 }
  0xee   : > { %v861_v33 = vpop.eup %860  ;;  %640 = vst [vmem:[%s1279_s17 + $0xa8] sm:$0xff] %v608_v30  ;;  %v520_v32 = vmul.f32 0.5, %v519_v59  ;;  %vm515_vm2 = vmor %vm513_vm11, %vm514_vm14 }
  0xef   : > { %v863_v31 = vpop.eup %862  ;;  %v532_v22 = vmul.f32 %v1543_v46, %v531_v10  ;;  %v558_v44 = vmul.f32 %v861_v33, %v1551_v39  ;;  %v510_v3 = vmul.f32 0.5, %v509_v43  ;;  %vm564_vm1 = vweird.f32 %v861_v33 }
  0xf0   : > { %v1592_v11 = vpop.xlane.xlu1 %265  ;;  %v865_v21 = vpop.eup %864  ;;  %v548_v23 = vmul.f32 %v863_v31, %v1553_v8  ;;  %v521_v6 = vsub.f32 1.5, %v520_v32  ;;  %vm554_vm3 = vweird.f32 %v863_v31  ;;  %vm565_vm5 = vmor %vm563_vm15, %vm564_vm1 }
  0xf1   : > { %866 = vrsqrt.f32 %v1592_v11  ;;  %v536_v4 = vsel %vm535_vm12, %v1543_v46, %v532_v22  ;;  %v559_v63 = vmul.f32 %v861_v33, %v558_v44  ;;  %v538_v62 = vmul.f32 %v865_v21, %v1564_v38  ;;  %v1598_v27 = vpop.xlane.xlu0 %263  ;;  %vm555_vm7 = vmor %vm553_vm6, %vm554_vm3 }
  0xf2   : > { %v613_v5 = vmul.f32 %v536_v4, %v1201_v48  ;;  %v511_v15 = vsub.f32 1.5, %v510_v3  ;;  %v549_v13 = vmul.f32 %v863_v31, %v548_v23  ;;  %v522_v24 = vmul.f32 %v857_v35, %v521_v6 }
  0xf3   : > { %v560_v40 = vmul.f32 0.5, %v559_v63  ;;  %v539_v41 = vmul.f32 %v865_v21, %v538_v62  ;;  %868 = vrsqrt.f32 %v1598_v27  ;;  %vm544_vm4 = vweird.f32 %v865_v21 }
  0xf4   : > { %645 = vst [vmem:[%s1279_s17 + $0xd0] sm:$0xff] %v613_v5  ;;  %v512_v0 = vmul.f32 %v859_v47, %v511_v15  ;;  %v550_v29 = vmul.f32 0.5, %v549_v13  ;;  %v526_v48 = vsel %vm525_vm0, %v857_v35, %v522_v24  ;;  %vm545_vm9 = vmor %vm543_vm8, %vm544_vm4  ;;  %vm583_vm11 = vweird.f32 %v1592_v11 }
  0xf5   : > { %v561_v51 = vsub.f32 1.5, %v560_v40  ;;  %v540_v36 = vmul.f32 0.5, %v539_v41  ;;  %v612_v1 = vmul.f32 %v526_v48, %v1204_v49  ;;  %vm573_vm14 = vweird.f32 %v1598_v27 }
  0xf6   : > { %v516_v46 = vsel %vm515_vm2, %v859_v47, %v512_v0  ;;  %v551_v53 = vsub.f32 1.5, %v550_v29 }
  0xf7   : > { %v867_v9 = vpop.eup %866  ;;  %v611_v16 = vmul.f32 %v516_v46, %v1207_v50  ;;  %v562_v34 = vmul.f32 %v861_v33, %v561_v51  ;;  %v541_v17 = vsub.f32 1.5, %v540_v36  ;;  %644 = vst [vmem:[%s1279_s17 + $0xc8] sm:$0xff] %v612_v1 }
  0xf8   : > { %v578_v25 = vmul.f32 %v867_v9, %v1592_v11  ;;  %v552_v45 = vmul.f32 %v863_v31, %v551_v53  ;;  %vm584_vm10 = vweird.f32 %v867_v9 }
  0xf9   : > { %643 = vst [vmem:[%s1279_s17 + $0xc0] sm:$0xff] %v611_v16  ;;  %v566_v49 = vsel %vm565_vm5, %v861_v33, %v562_v34  ;;  %v542_v50 = vmul.f32 %v865_v21, %v541_v17  ;;  %v869_v12 = vpop.eup %868  ;;  %vm585_vm12 = vmor %vm583_vm11, %vm584_vm10 }
  0xfa   : > { %v579_v28 = vmul.f32 %v867_v9, %v578_v25  ;;  %v616_v7 = vmul.f32 %v566_v49, %v1216_v54  ;;  %v556_v39 = vsel %vm555_vm7, %v863_v31, %v552_v45  ;;  %v568_v2 = vmul.f32 %v869_v12, %v1598_v27 }
  0xfb   : > { %v615_v37 = vmul.f32 %v556_v39, %v1219_v55  ;;  %v546_v8 = vsel %vm545_vm9, %v865_v21, %v542_v50  ;;  %vm574_vm13 = vweird.f32 %v869_v12 }
  0xfc   : > { %v580_v14 = vmul.f32 0.5, %v579_v28  ;;  %648 = vst [vmem:[%s1279_s17 + $0xe8] sm:$0xff] %v616_v7  ;;  %v614_v18 = vmul.f32 %v546_v8, %v1222_v56  ;;  %v569_v35 = vmul.f32 %v869_v12, %v568_v2  ;;  %vm575_vm15 = vmor %vm573_vm14, %vm574_vm13 }
  0xfd   : > { %647 = vst [vmem:[%s1279_s17 + $0xe0] sm:$0xff] %v615_v37 }
  0xfe   : > { %v581_v38 = vsub.f32 1.5, %v580_v14  ;;  %646 = vst [vmem:[%s1279_s17 + $0xd8] sm:$0xff] %v614_v18  ;;  %v570_v26 = vmul.f32 0.5, %v569_v35 }
 0x100   : > { %v582_v54 = vmul.f32 %v867_v9, %v581_v38  ;;  %v571_v56 = vsub.f32 1.5, %v570_v26 }
 0x102   : > { %v586_v55 = vsel %vm585_vm12, %v867_v9, %v582_v54  ;;  %v572_v47 = vmul.f32 %v869_v12, %v571_v56 }
 0x103   : > { %v618_v57 = vmul.f32 %v586_v55, %v1231_v60 }
 0x104   : > { %v576_v52 = vsel %vm575_vm15, %v869_v12, %v572_v47 }
 0x105   : > { %650 = vst [vmem:[%s1279_s17 + $0xf8] sm:$0xff] %v618_v57  ;;  %v617_v19 = vmul.f32 %v576_v52, %v1234_v61 }
 0x107   : > { %649 = vst [vmem:[%s1279_s17 + $0xf0] sm:$0xff] %v617_v19 }
 0x108   : > { %927 = shalt.err (!%p924_p4)
}
 0x109   : > { %s970_s16 = smov 128   ;;  %s971_s20 = smov 8  }
 0x10a   : > { %758 = dma.vmem_to_hbm [thread:$0]  (%p1032_p11), %s665_s10, 4096, %s667_s29, %s652_s30, %s970_s16, %s970_s16, %s971_s20  }
 0x10b PF: > { %s681_s21 = sand.u32 1, %s954_s6   ;;  %p1675_p7 = scmp.ge.s32.totalorder %s966_s9, 2 }
 0x10c   : > { %s682_s22 = scalar_lea.sflag [#allocation4], %s681_s21 }
 0x10d   : > { %p765_p5 = pnand %p1675_p7, %p1036_p12 }
 0x10f   : > { %p766_p8 = pneg %p765_p5 }
 0x111   : > { %949 = dma.done.wait (%p766_p8), %s682_s22, 4096  }
 0x112   : > { %951 = vsyncadd (%p766_p8), %s682_s22, 4294963200  ;;  %p14_p10 = scmp.ge.s32.totalorder %s1007_s12, 4   ;;  %s1676_s6 = smov %s958_s7 }
 0x113   : > { %s1677_s7 = smov %s962_s8  ;;  %s1678_s8 = smov %s1019_s15 }
 0x114   : > { %s1679_s9 = smov %s1007_s12  ;;  %16 = sbr.rel (!%p14_p10) target bundleno = 5 (0x5), region = 69 }
 0x119   :  { %688 = vsyncpa [#allocation3], 1 }
 0x11a   :  { %690 = vsyncpa [#allocation3 + $0x1], 1 }
 0x11b   :  { %691 = vsyncpa [#allocation4], 1 }
 0x11c   :  { %693 = vsyncpa [#allocation4 + $0x1], 1 }

</bundles_post_ra>
